<compile_context>
chip_gen: v7x
topology: tpu7x:2x2x1
jax: 0.10.0
libtpu: 0.0.40
codegen_flags: <defaults>
</compile_context>

<pallas_src>
import functools

import jax
import jax.numpy as jnp
from jax.experimental import pallas as pl
from jax.experimental.pallas import tpu as pltpu


def _round_up(x, m):
    return (x + m - 1) // m * m


# --------------------------------------------------------------------------- #
# Kernels
# --------------------------------------------------------------------------- #
def _mlp_resident_kernel(x_ref, a1_ref, b1_ref, w1_ref, bb1_ref,
                         w2_ref, bb2_ref, a2_ref, b2_ref, o_ref,
                         *, approximate_gelu):
    """Weights fully VMEM-resident; one grid axis over row tiles."""
    # Affine #1 in f32, then bf16 for the MXU.
    x = x_ref[...].astype(jnp.float32) * a1_ref[...] + b1_ref[...]
    h = jnp.dot(x.astype(jnp.bfloat16), w1_ref[...],
                preferred_element_type=jnp.float32)
    h = jax.nn.gelu(h + bb1_ref[...], approximate=approximate_gelu)
    # Dropout -> identity (inference / eval mode).
    y = jnp.dot(h.astype(jnp.bfloat16), w2_ref[...],
                preferred_element_type=jnp.float32)
    y = (y + bb2_ref[...]) * a2_ref[...] + b2_ref[...]
    o_ref[...] = y.astype(o_ref.dtype)


def _mlp_chunked_kernel(x_ref, a1_ref, b1_ref, w1_ref, bb1_ref,
                        w2_ref, bb2_ref, a2_ref, b2_ref, o_ref, xb_ref,
                        *, approximate_gelu):
    """Hidden dim streamed in chunks; partials accumulate directly into o_ref (f32)."""
    h_idx = pl.program_id(1)

    @pl.when(h_idx == 0)
    def _():
        # Hoisted Affine#1 + bf16 cast: done once per row tile, reused for all h.
        x = x_ref[...].astype(jnp.float32) * a1_ref[...] + b1_ref[...]
        xb_ref[...] = x.astype(jnp.bfloat16)
        o_ref[...] = jnp.zeros_like(o_ref)

    h = jnp.dot(xb_ref[...], w1_ref[...], preferred_element_type=jnp.float32)
    h = jax.nn.gelu(h + bb1_ref[...], approximate=approximate_gelu)
    # Dropout -> identity (inference / eval mode).
    o_ref[...] += jnp.dot(h.astype(jnp.bfloat16), w2_ref[...],
                          preferred_element_type=jnp.float32)

    @pl.when(h_idx == pl.num_programs(1) - 1)
    def _():
        o_ref[...] = (o_ref[...] + bb2_ref[...]) * a2_ref[...] + b2_ref[...]


# --------------------------------------------------------------------------- #
# Wrapper
# --------------------------------------------------------------------------- #
def mlp_block(x, params, *, tm=None, th=None, approximate_gelu=True):
    """x: (B, N, dim) float32. params: dict of kernel-ready parameters."""
    B, N, D = x.shape
    H = params["w1"].shape[1]
    M = B * N

    # Lane-dense padding: last dims to multiples of 128.
    Dp = _round_up(D, 128)
    Hp = _round_up(H, 128)

    # Generation-aware VMEM budget (per TensorCore). Fallback 64 MiB = v7x.
    try:
        vmem_physical = int(pltpu.get_tpu_info().vmem_capacity_bytes)
    except Exception:  # noqa: BLE001 - conservative fallback if query unavailable
        vmem_physical = 64 << 20
    vmem_budget = min(int(vmem_physical * 0.75), vmem_physical - (16 << 20))

    # ----- Row tile ---------------------------------------------------------
    if tm is None:
        tm = 512
    tm = max(8, _round_up(min(tm, _round_up(M, 8)), 8))
    # Megacore (v7x has 2 TCs): keep the "parallel" row axis at >= 2 tiles.
    if M > 8 and _round_up(M, tm) // tm < 2:
        tm = _round_up(-(-M // 2), 8)

    # ----- Footprint models (conservative: assume 2 buffers for weights) ----
    def resident_footprint(tm_):
        return (2 * tm_ * Dp * 4            # x tiles (double-buffered)
                + 2 * tm_ * Dp * 4          # out tiles
                + 2 * 2 * Dp * Hp * 2       # W1 + W2 bf16 (2 buffers assumed)
                + 4 * Hp * 4 + 10 * Dp * 4  # biases / affines
                + tm_ * Hp * 6)             # (tm, Hp) GELU intermediate headroom

    def chunked_footprint(tm_, th_):
        return (2 * tm_ * Dp * 4 + 2 * tm_ * Dp * 4
                + 2 * Dp * th_ * 2 + 2 * th_ * Dp * 2
                + tm_ * Dp * 2              # xb bf16 scratch
                + 4 * th_ * 4 + 10 * Dp * 4
                + tm_ * th_ * 6)

    # ----- Resident-weight path if it fits ----------------------------------
    resident = False
    if th is None or th >= Hp:
        t = tm
        while True:
            if resident_footprint(t) <= vmem_budget:
                resident, tm, th = True, t, Hp
                break
            if t <= 128:
                break
            t = max(128, _round_up(t // 2, 8))

    if not resident:
        if th is None:
            th = 128
            for cand in (512, 256):  # 256-multiples only (v6e/v7x MXU is 2x256)
                if Hp % cand == 0 and chunked_footprint(tm, cand) <= vmem_budget:
                    th = cand
                    break
        th = min(Hp, _round_up(th, 128))
        assert Hp % th == 0, (Hp, th)
        while chunked_footprint(tm, th) > vmem_budget and tm > 64:
            tm = max(64, _round_up(tm // 2, 8))

    Mp = _round_up(M, tm)

    # ----- Pad operands (zeros keep the math exact; padding sliced off) -----
    x2 = x.reshape(M, D).astype(jnp.float32)
    x2 = jnp.pad(x2, ((0, Mp - M), (0, Dp - D)))

    def pad2(a, r, c, dtype):
        a = a.astype(dtype)
        return jnp.pad(a, ((0, r - a.shape[0]), (0, c - a.shape[1])))

    w1 = pad2(params["w1"], Dp, Hp, jnp.bfloat16)
    w2 = pad2(params["w2"], Hp, Dp, jnp.bfloat16)
    a1 = pad2(params["alpha1"], 1, Dp, jnp.float32)
    b1 = pad2(params["beta1"], 1, Dp, jnp.float32)
    bb1 = pad2(params["b1"], 1, Hp, jnp.float32)
    bb2 = pad2(params["b2"], 1, Dp, jnp.float32)
    a2 = pad2(params["alpha2"], 1, Dp, jnp.float32)
    b2 = pad2(params["beta2"], 1, Dp, jnp.float32)

    # ----- Specs -------------------------------------------------------------
    if resident:
        grid = (Mp // tm,)

        def w_spec(shape):
            idx = lambda i: (0, 0)
            if hasattr(pl, "Buffered"):
                try:
                    # Constant block index -> nothing to overlap; 1 buffer saves VMEM.
                    return pl.BlockSpec(shape, idx, pipeline_mode=pl.Buffered(1))
                except TypeError:
                    pass
            return pl.BlockSpec(shape, idx)

        const_spec = lambda d: pl.BlockSpec((1, d), lambda i: (0, 0))
        in_specs = [
            pl.BlockSpec((tm, Dp), lambda i: (i, 0)),   # x tile
            const_spec(Dp),                             # alpha1
            const_spec(Dp),                             # beta1
            w_spec((Dp, Hp)),                           # W1 (resident)
            const_spec(Hp),                             # b1
            w_spec((Hp, Dp)),                           # W2 (resident)
            const_spec(Dp),                             # b2
            const_spec(Dp),                             # alpha2
            const_spec(Dp),                             # beta2
        ]
        out_spec = pl.BlockSpec((tm, Dp), lambda i: (i, 0))
        scratch = []
        kernel = functools.partial(_mlp_resident_kernel,
                                   approximate_gelu=approximate_gelu)
        dim_sem = ("parallel",)
        weight_reads = 1
        footprint = resident_footprint(tm)
    else:
        grid = (Mp // tm, Hp // th)
        const_spec = lambda d: pl.BlockSpec((1, d), lambda i, h: (0, 0))
        in_specs = [
            pl.BlockSpec((tm, Dp), lambda i, h: (i, 0)),  # x tile
            const_spec(Dp),                               # alpha1
            const_spec(Dp),                               # beta1
            pl.BlockSpec((Dp, th), lambda i, h: (0, h)),  # W1 chunk
            pl.BlockSpec((1, th), lambda i, h: (0, h)),   # b1 chunk
            pl.BlockSpec((th, Dp), lambda i, h: (h, 0)),  # W2 chunk
            const_spec(Dp),                               # b2
            const_spec(Dp),                               # alpha2
            const_spec(Dp),                               # beta2
        ]
        out_spec = pl.BlockSpec((tm, Dp), lambda i, h: (i, 0))
        scratch = [pltpu.VMEM((tm, Dp), jnp.bfloat16)]    # hoisted bf16 x tile
        kernel = functools.partial(_mlp_chunked_kernel,
                                   approximate_gelu=approximate_gelu)
        dim_sem = ("parallel", "arbitrary")
        weight_reads = Mp // tm
        footprint = chunked_footprint(tm, th)

    vmem_limit = int(min(vmem_budget, max(footprint + (8 << 20), 32 << 20)))

    weight_bytes = 2 * Dp * Hp * 2  # W1 + W2 in bf16
    cost = pl.CostEstimate(
        flops=4 * Mp * Dp * Hp,
        transcendentals=Mp * Hp,
        bytes_accessed=(2 * Mp * Dp * 4            # x in + out
                        + weight_reads * weight_bytes
                        + (Hp + 6 * Dp) * 4),
    )

    out = pl.pallas_call(
        kernel,
        out_shape=jax.ShapeDtypeStruct((Mp, Dp), jnp.float32),
        grid_spec=pltpu.PrefetchScalarGridSpec(
            num_scalar_prefetch=0,
            grid=grid,
            in_specs=in_specs,
            out_specs=out_spec,
            scratch_shapes=scratch,
        ),
        compiler_params=pltpu.CompilerParams(
            dimension_semantics=dim_sem,
            vmem_limit_bytes=vmem_limit,
        ),
        cost_estimate=cost,
    )(x2, a1, b1, w1, bb1, w2, bb2, a2, b2)

    out = out[:M, :D].astype(x.dtype)
    return out.reshape(B, N, D)


# --------------------------------------------------------------------------- #
# Params / reference / self-test
# --------------------------------------------------------------------------- #
def init_params(dim, key):
    """Deterministic parameter init mirroring the module's shapes."""
    hidden = 4 * dim
    k1, k2, k3, k4 = jax.random.split(key, 4)
    alpha1 = jnp.ones((1, dim), jnp.float32)
    beta1 = jnp.ones((1, dim), jnp.float32)
    alpha2 = jnp.ones((1, dim), jnp.float32)
    beta2 = jnp.ones((1, dim), jnp.float32)
    lim1 = 1.0 / jnp.sqrt(dim)
    lim2 = 1.0 / jnp.sqrt(hidden)
    # torch stores (out, in); we keep (in, out) for x @ W.
    w1 = jax.random.uniform(k1, (dim, hidden), jnp.float32, -lim1, lim1)
    b1 = jax.random.uniform(k2, (1, hidden), jnp.float32, -lim1, lim1)
    w2 = jax.random.uniform(k3, (hidden, dim), jnp.float32, -lim2, lim2)
    b2 = jax.random.uniform(k4, (1, dim), jnp.float32, -lim2, lim2)
    return dict(alpha1=alpha1, beta1=beta1, w1=w1, b1=b1,
                w2=w2, b2=b2, alpha2=alpha2, beta2=beta2)


def mlp_block_ref(x, p, *, mxu_dtype=jnp.float32, approximate_gelu=True):
    """Pure-JAX reference of the PyTorch forward (inference mode)."""
    y = x * p["alpha1"][None] + p["beta1"][None]
    y = jnp.einsum("bnd,dh->bnh", y.astype(mxu_dtype),
                   p["w1"].astype(mxu_dtype),
                   preferred_element_type=jnp.float32) + p["b1"][None]
    y = jax.nn.gelu(y, approximate=approximate_gelu)
    y = jnp.einsum("bnh,hd->bnd", y.astype(mxu_dtype),
                   p["w2"].astype(mxu_dtype),
                   preferred_element_type=jnp.float32) + p["b2"][None]
    y = y * p["alpha2"][None] + p["beta2"][None]
    return y


if __name__ == "__main__":
    key = jax.random.PRNGKey(0)
    kx, kp = jax.random.split(key)

    B, N, dim = 2, 8, 32           # batch=2, seq=8, dim=32 (hidden=128)
    x = jax.random.normal(kx, (B, N, dim), jnp.float32)
    params = init_params(dim, kp)

    out = jax.block_until_ready(mlp_block(x, params))
    assert out.shape == (B, N, dim)

    # Tight check against a reference emulating the kernel's bf16 MXU + tanh-GELU
    # path, plus a loose sanity check against the full-f32 exact-erf reference.
    ref_bf16 = mlp_block_ref(x, params, mxu_dtype=jnp.bfloat16,
                             approximate_gelu=True)
    ref_f32 = mlp_block_ref(x, params, mxu_dtype=jnp.float32,
                            approximate_gelu=False)
    assert jnp.allclose(out, ref_bf16, atol=1e-2, rtol=1e-2), \
        float(jnp.max(jnp.abs(out - ref_bf16)))
    assert jnp.allclose(out, ref_f32, atol=1e-1, rtol=1e-1), \
        float(jnp.max(jnp.abs(out - ref_f32)))

    print("KERNEL_OK")
</pallas_src>

<mosaic_0001>
module attributes {stable_mosaic.version = 11 : i64} {
  func.func @_mlp_resident_kernel(%arg0: i32, %arg1: memref<8x128xf32, #tpu.memory_space<vmem>>, %arg2: memref<1x128xf32, #tpu.memory_space<vmem>>, %arg3: memref<1x128xf32, #tpu.memory_space<vmem>>, %arg4: memref<128x128xbf16, #tpu.memory_space<vmem>>, %arg5: memref<1x128xf32, #tpu.memory_space<vmem>>, %arg6: memref<128x128xbf16, #tpu.memory_space<vmem>>, %arg7: memref<1x128xf32, #tpu.memory_space<vmem>>, %arg8: memref<1x128xf32, #tpu.memory_space<vmem>>, %arg9: memref<1x128xf32, #tpu.memory_space<vmem>>, %arg10: memref<8x128xf32, #tpu.memory_space<vmem>>) attributes {dimension_semantics = [#tpu.dimension_semantics<parallel>], iteration_bounds = array<i64: 2>, scalar_prefetch = 0 : i64, scratch_operands = 0 : i64, tpu.core_type = #tpu.core_type<tc>, window_params = [{transform_indices = @transform_0, window_bounds = array<i64: 8, 128>}, {pipeline_mode = #tpu.pipeline_mode<synchronous>, transform_indices = @transform_1, window_bounds = array<i64: 1, 128>}, {pipeline_mode = #tpu.pipeline_mode<synchronous>, transform_indices = @transform_2, window_bounds = array<i64: 1, 128>}, {pipeline_mode = #tpu.pipeline_mode<synchronous>, transform_indices = @transform_3, window_bounds = array<i64: 128, 128>}, {pipeline_mode = #tpu.pipeline_mode<synchronous>, transform_indices = @transform_4, window_bounds = array<i64: 1, 128>}, {pipeline_mode = #tpu.pipeline_mode<synchronous>, transform_indices = @transform_5, window_bounds = array<i64: 128, 128>}, {pipeline_mode = #tpu.pipeline_mode<synchronous>, transform_indices = @transform_6, window_bounds = array<i64: 1, 128>}, {pipeline_mode = #tpu.pipeline_mode<synchronous>, transform_indices = @transform_7, window_bounds = array<i64: 1, 128>}, {pipeline_mode = #tpu.pipeline_mode<synchronous>, transform_indices = @transform_8, window_bounds = array<i64: 1, 128>}, {transform_indices = @transform_9, window_bounds = array<i64: 8, 128>}]} {
    %c0 = arith.constant 0 : index
    %c0_0 = arith.constant 0 : index
    %0 = vector.load %arg1[%c0, %c0_0] : memref<8x128xf32, #tpu.memory_space<vmem>>, vector<8x128xf32>
    %c0_1 = arith.constant 0 : index
    %c0_2 = arith.constant 0 : index
    %1 = vector.load %arg2[%c0_1, %c0_2] : memref<1x128xf32, #tpu.memory_space<vmem>>, vector<1x128xf32>
    %2 = vector.broadcast %1 : vector<1x128xf32> to vector<8x128xf32>
    %3 = arith.mulf %0, %2 : vector<8x128xf32>
    %c0_3 = arith.constant 0 : index
    %c0_4 = arith.constant 0 : index
    %4 = vector.load %arg3[%c0_3, %c0_4] : memref<1x128xf32, #tpu.memory_space<vmem>>, vector<1x128xf32>
    %5 = vector.broadcast %4 : vector<1x128xf32> to vector<8x128xf32>
    %6 = arith.addf %3, %5 : vector<8x128xf32>
    %7 = arith.truncf %6 : vector<8x128xf32> to vector<8x128xbf16>
    %c0_5 = arith.constant 0 : index
    %c0_6 = arith.constant 0 : index
    %8 = vector.load %arg4[%c0_5, %c0_6] : memref<128x128xbf16, #tpu.memory_space<vmem>>, vector<128x128xbf16>
    %cst = arith.constant dense<0.000000e+00> : vector<8x128xf32>
    %9 = tpu.matmul %7, %8, %cst {dimension_numbers = #tpu.dot_dimension_numbers<[1], [0], [0], [1], [0, 0, 1, 1], [], []>} : vector<8x128xbf16>, vector<128x128xbf16>, vector<8x128xf32> -> vector<8x128xf32>
    %c0_7 = arith.constant 0 : index
    %c0_8 = arith.constant 0 : index
    %10 = vector.load %arg5[%c0_7, %c0_8] : memref<1x128xf32, #tpu.memory_space<vmem>>, vector<1x128xf32>
    %11 = vector.broadcast %10 : vector<1x128xf32> to vector<8x128xf32>
    %12 = arith.addf %9, %11 : vector<8x128xf32>
    %13 = arith.mulf %12, %12 : vector<8x128xf32>
    %14 = arith.mulf %12, %13 : vector<8x128xf32>
    %cst_9 = arith.constant 4.471500e-02 : f32
    %15 = vector.broadcast %cst_9 : f32 to vector<8x128xf32>
    %16 = arith.mulf %15, %14 : vector<8x128xf32>
    %17 = arith.addf %12, %16 : vector<8x128xf32>
    %cst_10 = arith.constant 0.797884583 : f32
    %18 = vector.broadcast %cst_10 : f32 to vector<8x128xf32>
    %19 = arith.mulf %18, %17 : vector<8x128xf32>
    %20 = math.tanh %19 : vector<8x128xf32>
    %cst_11 = arith.constant 1.000000e+00 : f32
    %21 = vector.broadcast %cst_11 : f32 to vector<8x128xf32>
    %22 = arith.addf %21, %20 : vector<8x128xf32>
    %cst_12 = arith.constant 5.000000e-01 : f32
    %23 = vector.broadcast %cst_12 : f32 to vector<8x128xf32>
    %24 = arith.mulf %23, %22 : vector<8x128xf32>
    %25 = arith.mulf %12, %24 : vector<8x128xf32>
    %26 = arith.truncf %25 : vector<8x128xf32> to vector<8x128xbf16>
    %c0_13 = arith.constant 0 : index
    %c0_14 = arith.constant 0 : index
    %27 = vector.load %arg6[%c0_13, %c0_14] : memref<128x128xbf16, #tpu.memory_space<vmem>>, vector<128x128xbf16>
    %cst_15 = arith.constant dense<0.000000e+00> : vector<8x128xf32>
    %28 = tpu.matmul %26, %27, %cst_15 {dimension_numbers = #tpu.dot_dimension_numbers<[1], [0], [0], [1], [0, 0, 1, 1], [], []>} : vector<8x128xbf16>, vector<128x128xbf16>, vector<8x128xf32> -> vector<8x128xf32>
    %c0_16 = arith.constant 0 : index
    %c0_17 = arith.constant 0 : index
    %29 = vector.load %arg7[%c0_16, %c0_17] : memref<1x128xf32, #tpu.memory_space<vmem>>, vector<1x128xf32>
    %30 = vector.broadcast %29 : vector<1x128xf32> to vector<8x128xf32>
    %31 = arith.addf %28, %30 : vector<8x128xf32>
    %c0_18 = arith.constant 0 : index
    %c0_19 = arith.constant 0 : index
    %32 = vector.load %arg8[%c0_18, %c0_19] : memref<1x128xf32, #tpu.memory_space<vmem>>, vector<1x128xf32>
    %33 = vector.broadcast %32 : vector<1x128xf32> to vector<8x128xf32>
    %34 = arith.mulf %31, %33 : vector<8x128xf32>
    %c0_20 = arith.constant 0 : index
    %c0_21 = arith.constant 0 : index
    %35 = vector.load %arg9[%c0_20, %c0_21] : memref<1x128xf32, #tpu.memory_space<vmem>>, vector<1x128xf32>
    %36 = vector.broadcast %35 : vector<1x128xf32> to vector<8x128xf32>
    %37 = arith.addf %34, %36 : vector<8x128xf32>
    %c0_22 = arith.constant 0 : index
    %c0_23 = arith.constant 0 : index
    %38 = vector.load %arg10[%c0_22, %c0_23] : memref<8x128xf32, #tpu.memory_space<vmem>>, vector<8x128xf32>
    tpu.vector_store %arg10[%c0_22, %c0_23], %37 {strides = array<i32>} : memref<8x128xf32, #tpu.memory_space<vmem>>, vector<8x128xf32>,
    return
  }
  func.func @transform_0(%arg0: i32) -> (i32, i32) {
    %c0_i32 = arith.constant 0 : i32
    %c0_i32_0 = arith.constant 0 : i32
    return %arg0, %c0_i32 : i32, i32
  }
  func.func @transform_1(%arg0: i32) -> (i32, i32) {
    %c0_i32 = arith.constant 0 : i32
    %c0_i32_0 = arith.constant 0 : i32
    %c0_i32_1 = arith.constant 0 : i32
    return %c0_i32, %c0_i32_0 : i32, i32
  }
  func.func @transform_2(%arg0: i32) -> (i32, i32) {
    %c0_i32 = arith.constant 0 : i32
    %c0_i32_0 = arith.constant 0 : i32
    %c0_i32_1 = arith.constant 0 : i32
    return %c0_i32, %c0_i32_0 : i32, i32
  }
  func.func @transform_3(%arg0: i32) -> (i32, i32) {
    %c0_i32 = arith.constant 0 : i32
    %c0_i32_0 = arith.constant 0 : i32
    %c0_i32_1 = arith.constant 0 : i32
    return %c0_i32, %c0_i32_0 : i32, i32
  }
  func.func @transform_4(%arg0: i32) -> (i32, i32) {
    %c0_i32 = arith.constant 0 : i32
    %c0_i32_0 = arith.constant 0 : i32
    %c0_i32_1 = arith.constant 0 : i32
    return %c0_i32, %c0_i32_0 : i32, i32
  }
  func.func @transform_5(%arg0: i32) -> (i32, i32) {
    %c0_i32 = arith.constant 0 : i32
    %c0_i32_0 = arith.constant 0 : i32
    %c0_i32_1 = arith.constant 0 : i32
    return %c0_i32, %c0_i32_0 : i32, i32
  }
  func.func @transform_6(%arg0: i32) -> (i32, i32) {
    %c0_i32 = arith.constant 0 : i32
    %c0_i32_0 = arith.constant 0 : i32
    %c0_i32_1 = arith.constant 0 : i32
    return %c0_i32, %c0_i32_0 : i32, i32
  }
  func.func @transform_7(%arg0: i32) -> (i32, i32) {
    %c0_i32 = arith.constant 0 : i32
    %c0_i32_0 = arith.constant 0 : i32
    %c0_i32_1 = arith.constant 0 : i32
    return %c0_i32, %c0_i32_0 : i32, i32
  }
  func.func @transform_8(%arg0: i32) -> (i32, i32) {
    %c0_i32 = arith.constant 0 : i32
    %c0_i32_0 = arith.constant 0 : i32
    %c0_i32_1 = arith.constant 0 : i32
    return %c0_i32, %c0_i32_0 : i32, i32
  }
  func.func @transform_9(%arg0: i32) -> (i32, i32) {
    %c0_i32 = arith.constant 0 : i32
    %c0_i32_0 = arith.constant 0 : i32
    return %arg0, %c0_i32 : i32, i32
  }
}

</mosaic_0001>

<bundles_post_ra>
// kernel: tpu_custom_call.1
= control target key start
LH: loop header
LB: loop body
LE: loop exit
PB: predicated region body
PF: predicated region fallthrough
CT: control target
= control target key end

     0   :  { %14 = vsyncpa [#allocation3], 0  ;;  %s1400_s0 = inlined_call_operand.hbm [shape: f32[16,128], index: 0, kind: input, shape index: {}]   ;;  %s1401_s1 = inlined_call_operand.vmem [shape: f32[1,128], index: 1, kind: input, shape index: {}]   ;;  %s1402_s2 = inlined_call_operand.vmem [shape: f32[1,128], index: 2, kind: input, shape index: {}]   ;;  %s1403_s3 = inlined_call_operand.hbm [shape: bf16[128,128], index: 3, kind: input, shape index: {}]   ;;  %s1404_s4 = inlined_call_operand.vmem [shape: f32[1,128], index: 4, kind: input, shape index: {}]   ;;  %s1405_s5 = inlined_call_operand.hbm [shape: bf16[128,128], index: 5, kind: input, shape index: {}]   ;;  %s1406_s6 = inlined_call_operand.vmem [shape: f32[1,128], index: 6, kind: input, shape index: {}]   ;;  %s1407_s7 = inlined_call_operand.vmem [shape: f32[1,128], index: 7, kind: input, shape index: {}]   ;;  %s1408_s8 = inlined_call_operand.vmem [shape: f32[1,128], index: 8, kind: input, shape index: {}]   ;;  %s1409_s9 = inlined_call_operand.hbm [shape: f32[16,128], index: 9, kind: output, shape index: {}]  }
   0x1   :  { %16 = vsyncpa [#allocation3 + $0x1], 0 }
   0x2   :  { %17 = vsyncpa [#allocation6], 0 }
   0x3   :  { %18 = vsyncpa [#allocation4], 0 }
   0x4   :  { %20 = vsyncpa [#allocation4 + $0x1], 0  ;;  %s1149_s30 = smov 0   ;;  %s1151_s10 = smov 0  }
   0x5   :  { %s1153_s11 = smov 0   ;;  %s1155_s12 = smov 0  }
   0x6 LB: > { %s1170_s13 = sadd.s32 4294967295, %s1089_s12   ;;  %s748_s14 = sadd.s32 4294967294, %s1089_s12   ;;  %s1089_s12 = sphi %s1155_s12, %s1432_s12   ;;  %s1085_s11 = sphi %s1153_s11, %s1431_s11   ;;  %s1081_s10 = sphi %s1151_s10, %s1430_s10   ;;  %s1077_s30 = sphi %s1149_s30, %s1429_s30  }
   0x7   : > { %p46_p0 = scmp.ne.s32.totalorder %s1081_s10, %s1077_s30  ;;  %p1410_p1 = scmp.eq.s32.totalorder %s1170_s13, 0 }
   0x8   : > { %p244_p3 = scmp.eq.s32.totalorder %s748_s14, 1  ;;  %p749_p5 = scmp.ge.s32.totalorder %s1089_s12, 1 }
   0x9   : > { %p1179_p4 = por %p1410_p1, %p46_p0  ;;  %p251_p7 = scmp.lt.s32.totalorder %s1089_s12, 3 }
   0xa   : > { %p1184_p6 = por %p244_p3, %p46_p0  ;;  %s1091_s18 = smov [#allocation5]  }
   0xb   : > { %s1414_s15 = scalar_select %p1179_p4, 1, 0 }
   0xc   : > { %s1415_s16 = scalar_select %p1184_p6, 1, 0 }
   0xd   : > { %p1189_p8 = pnand %p749_p5, %p251_p7  ;;  %s269_s19 = sshll.u32 %s1091_s18, 4  ;;  %s1193_s19 = int_to_ptr.vmem [resolvable:$true] %s269_s19 }
   0xe   : > { %1416 = sst [smem:[#allocation12_spill]] %s1415_s16  ;;  %s1092_s21 = smov [#allocation7]  }
   0xf   : > { %p856_p9 = pneg %p1189_p8  ;;  %s285_s22 = sshll.u32 %s1092_s21, 4  ;;  %s1204_s22 = int_to_ptr.vmem [resolvable:$true] %s285_s22 }
  0x10   : > { %s933_s25 = scalar_lea.hbm %s1403_s3, 1024 }
  0x11   : > { %p1200_p11 = pnand %p856_p9, %p1410_p1  ;;  %p934_p12 = scmp.ne.s32.totalorder %s1403_s3, %s933_s25 }
  0x12   : > { %p940_p5 = scmp.lt.u32.totalorder %s933_s25, %s1403_s3 }
  0x13   : > { %p935_p13 = pneg %p1200_p11 }
  0x15   : > { %p936_p0 = pnand %p935_p13, %p934_p12 }
  0x17   : > { %p937_p3 = pneg %p936_p0 }
  0x19   : > { %p942_p7 = pnand %p940_p5, %p937_p3 }
  0x1b   : > { %945 = shalt.err (!%p942_p7)
}
  0x1c   : > { %s946_s14 = scalar_lea.vmem %s1193_s19, 1024  ;;  %p954_p2 = scmp.lt.s32.totalorder %s1193_s19, %s1193_s19 }
  0x1d   : > { %p947_p9 = scmp.ne.s32.totalorder %s1193_s19, %s946_s14  ;;  %p955_p12 = scmp.lt.s32.totalorder %s946_s14, %s946_s14 }
  0x1f   : > { %p949_p10 = pnand %p947_p9, %p935_p13  ;;  %p956_p0 = por %p955_p12, %p954_p2 }
  0x21   : > { %p950_p1 = pneg %p949_p10 }
  0x23   : > { %p957_p6 = pnand %p956_p0, %p950_p1 }
  0x25   : > { %960 = shalt.err (!%p957_p6)
}
  0x26   : > { %s1093_s18 = smov 64   ;;  %s1094_s21 = smov 4  }
  0x27   : > { %859 = dma.hbm_to_vmem [thread:$0]  (!%p1200_p11), %s1403_s3, 1024, %s1193_s19, [#allocation6], %s1093_s18, %s1093_s18, %s1094_s21  }
  0x28   : > { %s961_s27 = scalar_lea.hbm %s1405_s5, 1024 }
  0x29   : > { %p962_p2 = scmp.ne.s32.totalorder %s1405_s5, %s961_s27  ;;  %p968_p10 = scmp.lt.u32.totalorder %s961_s27, %s1405_s5 }
  0x2b   : > { %p964_p1 = pnand %p962_p2, %p935_p13 }
  0x2d   : > { %p965_p6 = pneg %p964_p1 }
  0x2f   : > { %p970_p3 = pnand %p968_p10, %p965_p6 }
  0x31   : > { %973 = shalt.err (!%p970_p3)
}
  0x32   : > { %s974_s19 = scalar_lea.vmem %s1204_s22, 1024  ;;  %p982_p12 = scmp.lt.s32.totalorder %s1204_s22, %s1204_s22 }
  0x33   : > { %p975_p5 = scmp.ne.s32.totalorder %s1204_s22, %s974_s19  ;;  %p983_p0 = scmp.lt.s32.totalorder %s974_s19, %s974_s19 }
  0x35   : > { %p977_p7 = pnand %p975_p5, %p935_p13  ;;  %p984_p2 = por %p983_p0, %p982_p12 }
  0x37   : > { %p978_p9 = pneg %p977_p7 }
  0x39   : > { %p985_p1 = pnand %p984_p2, %p978_p9 }
  0x3b   : > { %988 = shalt.err (!%p985_p1)
}
  0x3c   : > { %862 = dma.hbm_to_vmem [thread:$0]  (!%p1200_p11), %s1405_s5, 1024, %s1204_s22, [#allocation6], %s1093_s18, %s1093_s18, %s1094_s21  }
  0x3d   : > { %s1259_s24 = sadd.s32 1, %s1089_s12   ;;  %s33_s20 = sadd.s32 1, %s1085_s11 }
  0x3e   : > { %s30_s25 = ssub.s32 %s1089_s12, %s1259_s24  ;;  %p40_p13 = scmp.ne.s32.totalorder %s1085_s11, %s1081_s10 }
  0x3f   : > { %p31_p6 = scmp.eq.s32.totalorder %s30_s25, 0  ;;  %p41_p10 = scmp.eq.s32.totalorder %s1089_s12, 0 }
  0x40   : > { %p1419_p3 = scmp.eq.s32.totalorder %s1170_s13, 1  ;;  %p873_p7 = scmp.lt.s32.totalorder %s1089_s12, 2 }
  0x41   : > { %s1275_s27 = scalar_select %p31_p6, %s1085_s11, %s33_s20  }
  0x42   : > { %p1269_p5 = por %p1419_p3, %p40_p13  ;;  %p42_p9 = por %p41_p10, %p40_p13 }
  0x43   : > { %s308_s28 = sand.u32 1, %s1085_s11   ;;  %s754_s22 = sshll.u32 %s1089_s12, 7 }
  0x44   : > { %s1420_s26 = scalar_select %p1269_p5, 1, 0 }
  0x45   : > { %s753_s29 = sshll.u32 %s308_s28, 3  ;;  %s1282_s14 = scalar_lea.hbm %s1400_s0, %s754_s22 }
  0x46   : > { %s312_s19 = scalar_lea.vmem [#allocation2], %s753_s29  ;;  %p1286_p11 = pnand %p873_p7, %p42_p9 }
  0x47   : > { %s319_s16 = sshll.u32 %s312_s19, 4  ;;  %s309_s20 = scalar_lea.sflag [#allocation3], %s308_s28  ;;  %s1284_s16 = int_to_ptr.vmem [resolvable:$true] %s319_s16 }
  0x48   : > { %s989_s25 = scalar_lea.hbm %s1282_s14, 128  ;;  %p991_p0 = pneg %p1286_p11 }
  0x49   : > { %p990_p12 = scmp.ne.s32.totalorder %s1282_s14, %s989_s25  ;;  %s994_s18 = scalar_lea.hbm %s1400_s0, 256 }
  0x4a   : > { %p995_p13 = scmp.lt.u32.totalorder %s1282_s14, %s1400_s0  ;;  %p996_p6 = scmp.lt.u32.totalorder %s994_s18, %s989_s25 }
  0x4b   : > { %p992_p2 = pnand %p991_p0, %p990_p12  ;;  %p998_p3 = scmp.lt.u32.totalorder %s989_s25, %s1282_s14 }
  0x4c   : > { %p997_p10 = por %p996_p6, %p995_p13 }
  0x4d   : > { %p993_p1 = pneg %p992_p2 }
  0x4e   : > { %p999_p7 = por %p998_p3, %p997_p10 }
  0x50   : > { %p1000_p9 = pnand %p999_p7, %p993_p1 }
  0x52   : > { %1003 = shalt.err (!%p1000_p9)
}
  0x53   : > { %s1004_s28 = scalar_lea.vmem %s1284_s16, 128  ;;  %s1095_s22 = smov [#allocation2]  }
  0x54   : > { %p1005_p12 = scmp.ne.s32.totalorder %s1284_s16, %s1004_s28  ;;  %s1009_s29 = sshll.u32 %s1095_s22, 4  ;;  %s1010_s29 = int_to_ptr.vmem [resolvable:$false] %s1009_s29 }
  0x55   : > { %s1011_s21 = scalar_lea.vmem %s1010_s29, 256  ;;  %p1012_p4 = scmp.lt.s32.totalorder %s1284_s16, %s1010_s29 }
  0x56   : > { %p1007_p2 = pnand %p1005_p12, %p991_p0  ;;  %p1013_p13 = scmp.lt.s32.totalorder %s1011_s21, %s1004_s28 }
  0x58   : > { %p1008_p5 = pneg %p1007_p2  ;;  %p1014_p6 = por %p1013_p13, %p1012_p4 }
  0x5a   : > { %p1015_p10 = pnand %p1014_p6, %p1008_p5 }
  0x5c   : > { %1018 = shalt.err (!%p1015_p10)
}
  0x5d   : > { %866 = dma.hbm_to_vmem [thread:$0]  (!%p1286_p11), %s1282_s14, 128, %s1284_s16, %s309_s20  }
  0x5e   : > { %328 = sbr.rel (%p1189_p8) target bundleno = 614 (0x266), region = 56  ;;  %s1318_s25 = sand.u32 (!%p1189_p8), 1, %s1081_s10  }
  0x5f   : > { %s756_s18 = sshll.u32 (!%p1189_p8), %s1318_s25, 3  ;;  %s331_s19 = scalar_lea.sflag (!%p1189_p8), [#allocation3], %s1318_s25 }
  0x60   : > { %s334_s28 = scalar_lea.vmem (!%p1189_p8), [#allocation2], %s756_s18  ;;  %p1422_p4 = scmp.ne.s32.totalorder (!%p1189_p8), %s1414_s15, 0 }
  0x65   : > { %1064 = dma.done.wait (%p1422_p4), %s331_s19, 128  }
  0x66   : > { %1066 = vsyncadd (%p1422_p4), %s331_s19, 4294967168  ;;  %p1423_p5 = scmp.eq.s32.totalorder %s1170_s13, 0 }
  0x68   : > { %1068 = dma.done.wait (%p1423_p5), [#allocation6], 2048   ;;  %p1424_p8 = pmov %p1423_p5 }
  0x69   : > { %v1096_v0 = vmov 0.0   ;;  %vm1097_vm0 = vmmov 0   ;;  %v915_v1 = vld [vmem:[#allocation5] sm:$0xff]   ;;  %v916_v2 = vld [vmem:[#allocation5 + $0x8] sm:$0xff]   ;;  %v917_v3 = vld [vmem:[#allocation5 + $0x10] sm:$0xff]   ;;  %s783_s17 = sshll.u32 %s1170_s13, 7 }
  0x6a   : > { %1070 = vsyncadd (%p1424_p8), [#allocation6], 4294965248  ;;  %804 = vmatprep.subr.bf16.mxu0 %v1096_v0  ;;  %820 = vmatprep.mubr.msk.bf16.mxu0 %vm1097_vm0, %v1096_v0  ;;  %v918_v4 = vld [vmem:[#allocation5 + $0x18] sm:$0xff]   ;;  %v919_v5 = vld [vmem:[#allocation5 + $0x20] sm:$0xff]   ;;  %s376_s14 = scalar_lea.vmem [#allocation8], %s756_s18  ;;  %s1356_s22 = scalar_lea.hbm %s1409_s9, %s783_s17 }
  0x6b   : > { %824 = vmatprep.subr.bf16.mxu1 %v1096_v0  ;;  %840 = vmatprep.mubr.msk.bf16.mxu1 %vm1097_vm0, %v1096_v0  ;;  %v920_v6 = vld [vmem:[#allocation5 + $0x28] sm:$0xff]   ;;  %v378_v7 = vld [vmem:[%s334_s28] sm:$0xff]  ;;  %v923_v15 = vld [vmem:[#allocation7] sm:$0xff]   ;;  %s659_s16 = sshll.u32 %s376_s14, 4  ;;  %s646_s29 = scalar_lea.sflag [#allocation4], %s1318_s25  ;;  %s1358_s16 = int_to_ptr.vmem [resolvable:$true] %s659_s16 }
  0x6c   : > { %805 = vmatpush3.bf16.msra.mxu0 %v915_v1  ;;  %v760_v8 = vld [vmem:[%s1401_s1] ss:$0 sm:$0xff]  ;;  %v922_v13 = vld [vmem:[#allocation5 + $0x38] sm:$0xff]   ;;  %825 = vmatpush3.bf16.msra.mxu1 %v923_v15  ;;  %v924_v16 = vld [vmem:[#allocation7 + $0x8] sm:$0xff]   ;;  %s1019_s21 = scalar_lea.vmem %s1358_s16, 128  ;;  %p1425_p0 = scmp.ne.s32.totalorder %s1420_s26, 0 }
  0x6d   : > { %806 = vmatprep.subr.bf16.mxu0 %v1096_v0  ;;  %v386_v9 = vmul.f32 %v760_v8, %v378_v7  ;;  %v921_v10 = vld [vmem:[#allocation5 + $0x30] sm:$0xff]   ;;  %826 = vmatprep.subr.bf16.mxu1 %v1096_v0  ;;  %v926_v18 = vld [vmem:[#allocation7 + $0x18] sm:$0xff]   ;;  %v927_v19 = vld [vmem:[#allocation7 + $0x20] sm:$0xff]   ;;  %p1020_p11 = scmp.ne.s32.totalorder %s1358_s16, %s1019_s21  ;;  %s1098_s13 = smov [#allocation8]  }
  0x6e   : > { %v761_v11 = vld [vmem:[%s1402_s2] ss:$0 sm:$0xff]  ;;  %v928_v20 = vld [vmem:[#allocation7 + $0x28] sm:$0xff]   ;;  %v930_v22 = vld [vmem:[#allocation7 + $0x38] sm:$0xff]   ;;  %s1023_s18 = sshll.u32 %s1098_s13, 4  ;;  %s1024_s18 = int_to_ptr.vmem [resolvable:$false] %s1023_s18 }
  0x6f   : > { %v394_v12 = vadd.f32 %v761_v11, %v386_v9  ;;  %v925_v17 = vld [vmem:[#allocation7 + $0x10] sm:$0xff]   ;;  %p1021_p1 = pnand %p1020_p11, %p1425_p0  ;;  %s1025_s19 = scalar_lea.vmem %s1024_s18, 256 }
  0x70   : > { %807 = vmatpush3.bf16.msra.mxu0 %v916_v2  ;;  %827 = vmatpush3.bf16.msra.mxu1 %v924_v16  ;;  %v929_v21 = vld [vmem:[#allocation7 + $0x30] sm:$0xff]   ;;  %p1026_p7 = scmp.lt.s32.totalorder %s1358_s16, %s1024_s18  ;;  %p1027_p9 = scmp.lt.s32.totalorder %s1025_s19, %s1019_s21 }
  0x71   : > { %808 = vmatprep.subr.bf16.mxu0 %v1096_v0  ;;  %v395_v14 = vpack.c.bf16 %v394_v12, %v394_v12  ;;  %828 = vmatprep.subr.bf16.mxu1 %v1096_v0  ;;  %v762_v23 = vld [vmem:[%s1404_s4] ss:$0 sm:$0xff]  ;;  %p1022_p3 = pneg %p1021_p1 }
  0x72   : > { %v771_v39 = vld [vmem:[%s1406_s6] ss:$0 sm:$0xff]  ;;  %p1028_p12 = por %p1027_p9, %p1026_p7 }
  0x73   : > { %v780_v41 = vld [vmem:[%s1407_s7] ss:$0 sm:$0xff] }
  0x74   : > { %809 = vmatpush3.bf16.msra.mxu0 %v917_v3  ;;  %829 = vmatpush3.bf16.msra.mxu1 %v925_v17  ;;  %v781_v44 = vld [vmem:[%s1408_s8] ss:$0 sm:$0xff]  ;;  %p1029_p2 = pnand %p1028_p12, %p1022_p3 }
  0x75   : > { %810 = vmatprep.subr.bf16.mxu0 %v1096_v0  ;;  %830 = vmatprep.subr.bf16.mxu1 %v1096_v0 }
  0x78   : > { %811 = vmatpush3.bf16.msra.mxu0 %v918_v4  ;;  %831 = vmatpush3.bf16.msra.mxu1 %v926_v18 }
  0x79   : > { %812 = vmatprep.subr.bf16.mxu0 %v1096_v0  ;;  %832 = vmatprep.subr.bf16.mxu1 %v1096_v0 }
  0x7c   : > { %813 = vmatpush3.bf16.msra.mxu0 %v919_v5  ;;  %833 = vmatpush3.bf16.msra.mxu1 %v927_v19 }
  0x7d   : > { %814 = vmatprep.subr.bf16.mxu0 %v1096_v0  ;;  %834 = vmatprep.subr.bf16.mxu1 %v1096_v0 }
  0x80   : > { %815 = vmatpush3.bf16.msra.mxu0 %v920_v6  ;;  %835 = vmatpush3.bf16.msra.mxu1 %v928_v20 }
  0x81   : > { %816 = vmatprep.subr.bf16.mxu0 %v1096_v0  ;;  %836 = vmatprep.subr.bf16.mxu1 %v1096_v0 }
  0x84   : > { %817 = vmatpush3.bf16.msra.mxu0 %v921_v10  ;;  %837 = vmatpush3.bf16.msra.mxu1 %v929_v21 }
  0x85   : > { %818 = vmatprep.subr.bf16.mxu0 %v1096_v0  ;;  %838 = vmatprep.subr.bf16.mxu1 %v1096_v0 }
  0x88   : > { %819 = vmatpush3.bf16.msra.mxu0 %v922_v13  ;;  %839 = vmatpush3.bf16.msra.mxu1 %v930_v22 }
  0x8b   : > { %821 = vmatmul.mubr.bf16.vlgmr.msra.gmra.mrb[0].mxu0 %v395_v14 }
 0x15e   : > { %v501_v24 = vpop.f32.mrb[0].mxu0 }
 0x15f   : > { %v502_v25 = vadd.f32 %v762_v23, %v501_v24  ;;  %v822_v26 = vpop.f32.mrb[1].mxu0 }
 0x160   : > { %v504_v27 = vpop.f32.mrb[2].mxu0 }
 0x161   : > { %v507_v28 = vmul.f32 %v502_v25, %v502_v25  ;;  %v823_v29 = vpop.f32.mrb[3].mxu0 }
 0x163   : > { %v508_v30 = vmul.f32 %v507_v28, %v502_v25 }
 0x165   : > { %v509_v31 = vmul.f32 0.044715, %v508_v30 }
 0x167   : > { %v510_v32 = vadd.f32 %v509_v31, %v502_v25 }
 0x169   : > { %v511_v33 = vmul.f32 0.7978846, %v510_v32 }
 0x16b   : > { %931 = vtanh.f32 %v511_v33 }
 0x175   : > { %v932_v34 = vpop.eup %931 }
 0x176   : > { %v513_v35 = vadd.f32 1.0, %v932_v34 }
 0x178   : > { %v514_v36 = vmul.f32 0.5, %v513_v35 }
 0x17a   : > { %v515_v37 = vmul.f32 %v514_v36, %v502_v25 }
 0x17c   : > { %v516_v38 = vpack.c.bf16 %v515_v37, %v515_v37 }
 0x17e   : > { %841 = vmatmul.mubr.bf16.vlgmr.msra.gmra.mrb[0].mxu1 %v516_v38 }
 0x251   : > { %v622_v40 = vpop.f32.mrb[0].mxu1 }
 0x252   : > { %v623_v42 = vadd.f32 %v771_v39, %v622_v40  ;;  %v842_v43 = vpop.f32.mrb[1].mxu1 }
 0x253   : > { %v625_v45 = vpop.f32.mrb[2].mxu1 }
 0x254   : > { %v635_v46 = vmul.f32 %v780_v41, %v623_v42  ;;  %v843_v47 = vpop.f32.mrb[3].mxu1 }
 0x256   : > { %v643_v48 = vadd.f32 %v781_v44, %v635_v46 }
 0x258   : > { %644 = vst [vmem:[%s376_s14] sm:$0xff] %v643_v48 }
 0x259   : > { %1032 = shalt.err (!%p1029_p2)
}
 0x25a   : > { %s1033_s25 = scalar_lea.hbm %s1356_s22, 128  ;;  %s1037_s17 = scalar_lea.hbm %s1409_s9, 256 }
 0x25b   : > { %p1034_p13 = scmp.ne.s32.totalorder %s1356_s22, %s1033_s25  ;;  %p1038_p4 = scmp.lt.u32.totalorder %s1356_s22, %s1409_s9 }
 0x25c   : > { %p1039_p5 = scmp.lt.u32.totalorder %s1037_s17, %s1033_s25  ;;  %p1041_p11 = scmp.lt.u32.totalorder %s1033_s25, %s1356_s22 }
 0x25d   : > { %p1035_p6 = pnand %p1034_p13, %p1425_p0 }
 0x25e   : > { %p1040_p8 = por %p1039_p5, %p1038_p4 }
 0x25f   : > { %p1036_p10 = pneg %p1035_p6 }
 0x260   : > { %p1042_p1 = por %p1041_p11, %p1040_p8 }
 0x262   : > { %p1043_p3 = pnand %p1042_p1, %p1036_p10 }
 0x264   : > { %1046 = shalt.err (!%p1043_p3)
}
 0x265   : > { %854 = dma.vmem_to_hbm [thread:$0]  (%p1425_p0), %s1358_s16, 128, %s1356_s22, %s646_s29  }
 0x266 PF: > { %s1426_s20 = sld [smem:[#allocation12_spill]]  ;;  %s671_s21 = sand.u32 1, %s1077_s30  }
 0x267   : > { %p1428_p9 = scmp.ge.s32.totalorder %s1089_s12, 2  ;;  %s672_s13 = scalar_lea.sflag [#allocation4], %s671_s21 }
 0x26c   : > { %p1427_p7 = scmp.ne.s32.totalorder %s1426_s20, 0 }
 0x26e   : > { %p868_p12 = pnand %p1428_p9, %p1427_p7 }
 0x270   : > { %1072 = dma.done.wait (!%p868_p12), %s672_s13, 128  }
 0x271   : > { %1074 = vsyncadd (!%p868_p12), %s672_s13, 4294967168  ;;  %p23_p2 = scmp.ge.s32.totalorder %s1259_s24, 4   ;;  %s1429_s30 = smov %s1081_s10 }
 0x272   : > { %s1430_s10 = smov %s1085_s11  ;;  %s1431_s11 = smov %s1275_s27 }
 0x273   : > { %s1432_s12 = smov %s1259_s24  ;;  %25 = sbr.rel (!%p23_p2) target bundleno = 6 (0x6), region = 109 }
 0x27a   :  { %677 = vsyncpa [#allocation3], 1 }
 0x27b   :  { %679 = vsyncpa [#allocation3 + $0x1], 1 }
 0x27c   :  { %680 = vsyncpa [#allocation6], 1 }
 0x27d   :  { %681 = vsyncpa [#allocation4], 1 }
 0x27e   :  { %683 = vsyncpa [#allocation4 + $0x1], 1 }

</bundles_post_ra>
